<compile_context>
chip_gen: v7x
topology: tpu7x:2x2x1
jax: 0.10.0
libtpu: 0.0.40
codegen_flags: <defaults>
</compile_context>

<pallas_src>
import functools

import jax
import jax.numpy as jnp
from jax.experimental import pallas as pl
from jax.experimental.pallas import tpu as pltpu


def _cls_head_kernel(x_ref, w_ref, b_ref, o_ref, acc_ref, *, ts, inv_s):
    """One (batch-tile, spatial-tile) grid step.

    x_ref  : (TB, C, TS)  activation tile, native dtype (spatial on lanes)
    w_ref  : (C, Np)      weight in x's dtype, transposed, class-padded
    b_ref  : (1, Np)      f32 bias, class-padded
    o_ref  : (TB, Np)     output tile (resident across the spatial grid axis)
    acc_ref: (TB, C, 128) f32 lane-grouped partial-sum accumulator (scratch)
    """
    s = pl.program_id(1)

    @pl.when(s == 0)
    def _init():
        acc_ref[...] = jnp.zeros_like(acc_ref)

    n_full = ts // 128
    rem = ts % 128

    # Per-step work is pure VPU: convert + add 128-lane slabs (no XLU reduce,
    # no relayout), accumulated in registers then written once to scratch.
    if n_full > 0:
        part = x_ref[:, :, pl.ds(0, 128)].astype(jnp.float32)
        for g in range(1, n_full):
            part = part + x_ref[:, :, pl.ds(g * 128, 128)].astype(jnp.float32)
        acc_ref[...] += part
    if rem > 0:
        acc_ref[:, :, pl.ds(0, rem)] += (
            x_ref[:, :, pl.ds(n_full * 128, rem)].astype(jnp.float32))

    @pl.when(s == pl.num_programs(1) - 1)
    def _finalize():
        # Single cross-lane reduce per batch tile; mean scale applied in f32.
        pooled = jnp.sum(acc_ref[...], axis=-1) * inv_s            # (TB, C) f32
        logits = jnp.dot(pooled.astype(w_ref.dtype), w_ref[...],
                         preferred_element_type=jnp.float32) + b_ref[...]
        o_ref[...] = logits.astype(o_ref.dtype)


def _pick_tile(dim, max_tile, align):
    """Largest multiple of `align` that divides `dim` and is <= max_tile;
    falls back to the full dim (a full-extent block is always legal)."""
    t = (min(dim, max_tile) // align) * align
    while t >= align:
        if dim % t == 0:
            return t
        t -= align
    return dim


def _vmem_capacity_bytes():
    """Per-core VMEM capacity; conservative fallback if the query fails."""
    try:
        cap = getattr(pltpu.get_tpu_info(), "vmem_capacity_bytes", None)
        if cap:
            return int(cap)
    except Exception:
        pass
    return 64 << 20      # v7x per-TC capacity — safe lower bound everywhere


def classification_head(x_nchw, weight, bias, *, batch_tile=None, spatial_tile=None):
    """Forward pass of ClassificationHead: mean over (H, W) then Linear.

    x_nchw : (B, C, H, W) activation (any float dtype; streamed in native dtype)
    weight : (num_classes, C) nn.Linear weight
    bias   : (num_classes,)
    returns: (B, num_classes) logits in x's dtype
    """
    B, C, H, W = x_nchw.shape
    S = H * W
    num_classes = weight.shape[0]
    n_pad = pl.cdiv(num_classes, 128) * 128    # lane-dense class dim -> unmasked stores

    # Weight: keep x's dtype, transpose to contraction-major, zero-pad classes.
    # The 1/(H*W) scale is applied to the f32 accumulator in-kernel (never
    # folded into a possibly-bf16 weight).  Padded logit columns are 0+bias(0).
    w_t = jnp.pad(weight.astype(x_nchw.dtype).T,
                  ((0, 0), (0, n_pad - num_classes)))              # (C, Np)
    b_p = jnp.pad(bias.astype(jnp.float32),
                  (0, n_pad - num_classes)).reshape(1, n_pad)      # (1, Np)

    # Free reshape only — no transpose, no extra HBM pass.
    x_flat = x_nchw.reshape(B, C, S)                               # (B, C, S)

    x_item = x_flat.dtype.itemsize
    w_item = w_t.dtype.itemsize
    o_item = x_flat.dtype.itemsize

    # Weight spec: constant index_map (fetched once).  For large weights,
    # request a single VMEM buffer to halve the footprint; small weights keep
    # the default (costs nothing, avoids the extra pipeline mode).
    w_index_map = lambda b, s: (0, 0)
    w_bufs = 2
    w_spec = pl.BlockSpec((C, n_pad), w_index_map)
    if C * n_pad * w_item >= (2 << 20):
        try:
            w_spec = pl.BlockSpec((C, n_pad), w_index_map,
                                  pipeline_mode=pl.Buffered(1))
            w_bufs = 1
        except Exception:
            pass                        # older Pallas: keep double buffer
    b_spec = pl.BlockSpec((1, n_pad), lambda b, s: (0, 0))

    def working_set(tb_, ts_):
        return (2 * tb_ * C * ts_ * x_item          # double-buffered x tiles
                + w_bufs * C * n_pad * w_item       # weight buffer(s)
                + 2 * n_pad * 4                     # bias
                + 2 * tb_ * n_pad * o_item          # resident output
                + tb_ * C * 128 * 4)                # f32 accumulator scratch

    vmem_cap = _vmem_capacity_bytes()
    # ~75% of per-core VMEM for the kernel (≈48 MiB on v7x, ≈96 MiB on v5e/v6e).
    vmem_budget = min(vmem_cap * 3 // 4, 96 << 20)
    headroom = 4 << 20

    # ---- batch tile --------------------------------------------------------
    if batch_tile is not None:
        tb = batch_tile
    else:
        cap = 64
        if B >= 16:
            # >= 2 batch grid steps so the "parallel" axis can shard across
            # v7x's two TensorCores (free on single-TC v5e/v6e).
            cap = min(cap, max(8, (B // 2) // 8 * 8))
        tb = _pick_tile(B, cap, 8)
        # Shrink tb if even the narrowest legal spatial tile would blow the
        # budget — keeps the pipeline double-buffered instead of clamping
        # vmem_limit below the working set.
        min_ts = 128 if S % 128 == 0 else S
        while tb > 8 and working_set(tb, min_ts) + headroom > vmem_budget:
            smaller = _pick_tile(B, tb - 8, 8)
            if smaller >= tb:
                break
            tb = smaller

    # ---- spatial tile (fills the remaining VMEM budget) --------------------
    if spatial_tile is not None:
        ts = spatial_tile
    elif S % 128 == 0:
        avail = vmem_budget - headroom - working_set(tb, 0)
        max_ts = max(128, avail // (2 * tb * C * x_item) // 128 * 128)
        ts = _pick_tile(S, max_ts, 128)
    else:
        ts = S            # full-extent spatial block (always layout-legal)

    if B % tb != 0:
        raise ValueError(f"batch tile {tb} must divide batch {B}")
    if S % ts != 0:
        raise ValueError(f"spatial tile {ts} must divide H*W={S}")

    grid = (B // tb, S // ts)

    vmem_bytes = working_set(tb, ts) + headroom
    # Never clamp below the computed working set; never ask above physical.
    vmem_limit = int(min(max(vmem_bytes, 32 << 20), vmem_cap))

    cost = pl.CostEstimate(
        flops=2 * B * C * n_pad + B * C * S,
        transcendentals=0,
        bytes_accessed=(x_flat.size * x_item
                        + C * n_pad * w_item + n_pad * 4
                        + B * n_pad * o_item),
    )

    kernel = functools.partial(_cls_head_kernel, ts=ts, inv_s=1.0 / float(S))

    out_padded = pl.pallas_call(
        kernel,
        out_shape=jax.ShapeDtypeStruct((B, n_pad), x_nchw.dtype),
        grid=grid,
        in_specs=[
            pl.BlockSpec((tb, C, ts), lambda b, s: (b, 0, s)),
            w_spec,
            b_spec,
        ],
        out_specs=pl.BlockSpec((tb, n_pad), lambda b, s: (b, 0)),
        scratch_shapes=[pltpu.VMEM((tb, C, 128), jnp.float32)],
        compiler_params=pltpu.CompilerParams(
            dimension_semantics=("parallel", "arbitrary"),
            vmem_limit_bytes=vmem_limit,
        ),
        cost_estimate=cost,
    )(x_flat, w_t, b_p)

    return out_padded[:, :num_classes]


def classification_head_ref(x_nchw, weight, bias):
    """Pure-JAX reference matching the PyTorch forward."""
    pooled = jnp.mean(x_nchw.astype(jnp.float32), axis=(2, 3))     # (B, C)
    out = pooled @ weight.astype(jnp.float32).T + bias.astype(jnp.float32)
    return out.astype(x_nchw.dtype)


if __name__ == "__main__":
    B, C, H, W = 2, 4, 16, 16
    num_classes = 10

    key = jax.random.PRNGKey(0)
    kx, kw, kb = jax.random.split(key, 3)

    x = jax.random.normal(kx, (B, C, H, W), dtype=jnp.float32)
    weight = jax.random.normal(kw, (num_classes, C), dtype=jnp.float32) * 0.1
    bias = jax.random.normal(kb, (num_classes,), dtype=jnp.float32) * 0.1

    ref = classification_head_ref(x, weight, bias)

    # Default tiling (small shape -> whole spatial extent in one grid step).
    out = jax.block_until_ready(classification_head(x, weight, bias))
    assert out.shape == (B, num_classes)
    assert jnp.allclose(out, ref, atol=1e-4, rtol=1e-4), (
        f"max abs diff {jnp.max(jnp.abs(out - ref))}")

    # Force a 2-step spatial reduction to exercise the streamed accumulator.
    out2 = jax.block_until_ready(
        classification_head(x, weight, bias, spatial_tile=128))
    assert jnp.allclose(out2, ref, atol=1e-4, rtol=1e-4), (
        f"max abs diff {jnp.max(jnp.abs(out2 - ref))}")

    # bf16 activation path: weight streams as bf16, matmul runs native on MXU.
    x_bf = x.astype(jnp.bfloat16)
    ref_bf = classification_head_ref(x_bf, weight, bias).astype(jnp.float32)
    out_bf = jax.block_until_ready(
        classification_head(x_bf, weight, bias)).astype(jnp.float32)
    assert jnp.allclose(out_bf, ref_bf, atol=2e-2, rtol=2e-2), (
        f"max abs diff {jnp.max(jnp.abs(out_bf - ref_bf))}")

    print("KERNEL_OK")
</pallas_src>

<mosaic_0001>
module attributes {stable_mosaic.version = 11 : i64} {
  func.func @_cls_head_kernel(%arg0: i32, %arg1: i32, %arg2: memref<2x4x256xf32, #tpu.memory_space<vmem>>, %arg3: memref<4x128xf32, #tpu.memory_space<vmem>>, %arg4: memref<1x128xf32, #tpu.memory_space<vmem>>, %arg5: memref<2x128xf32, #tpu.memory_space<vmem>>, %arg6: memref<2x4x128xf32, #tpu.memory_space<vmem>>) attributes {dimension_semantics = [#tpu.dimension_semantics<parallel>, #tpu.dimension_semantics<arbitrary>], iteration_bounds = array<i64: 1, 1>, scalar_prefetch = 0 : i64, scratch_operands = 1 : i64, tpu.core_type = #tpu.core_type<tc>, window_params = [{transform_indices = @transform_0, window_bounds = array<i64: 2, 4, 256>}, {pipeline_mode = #tpu.pipeline_mode<synchronous>, transform_indices = @transform_1, window_bounds = array<i64: 4, 128>}, {pipeline_mode = #tpu.pipeline_mode<synchronous>, transform_indices = @transform_2, window_bounds = array<i64: 1, 128>}, {transform_indices = @transform_3, window_bounds = array<i64: 2, 128>}]} {
    %c0_i32 = arith.constant 0 : i32
    %0 = arith.cmpi eq, %arg1, %c0_i32 : i32
    %1 = arith.extui %0 : i1 to i32
    %c0_i32_0 = arith.constant 0 : i32
    %2 = arith.cmpi ne, %1, %c0_i32_0 : i32
    scf.if %2 {
      %cst = arith.constant 0.000000e+00 : f32
      %12 = vector.broadcast %cst : f32 to vector<2x4x128xf32>
      %c0_13 = arith.constant 0 : index
      %c0_14 = arith.constant 0 : index
      %c0_15 = arith.constant 0 : index
      %13 = vector.load %arg6[%c0_13, %c0_14, %c0_15] : memref<2x4x128xf32, #tpu.memory_space<vmem>>, vector<2x4x128xf32>
      tpu.vector_store %arg6[%c0_13, %c0_14, %c0_15], %12 {strides = array<i32>} : memref<2x4x128xf32, #tpu.memory_space<vmem>>, vector<2x4x128xf32>,
    } else {
    }
    %c0 = arith.constant 0 : index
    %c0_1 = arith.constant 0 : index
    %c0_2 = arith.constant 0 : index
    %3 = vector.load %arg2[%c0, %c0_1, %c0_2] : memref<2x4x256xf32, #tpu.memory_space<vmem>>, vector<2x4x128xf32>
    %c0_3 = arith.constant 0 : index
    %c0_4 = arith.constant 0 : index
    %c128 = arith.constant 128 : index
    %4 = vector.load %arg2[%c0_3, %c0_4, %c128] : memref<2x4x256xf32, #tpu.memory_space<vmem>>, vector<2x4x128xf32>
    %5 = arith.addf %3, %4 : vector<2x4x128xf32>
    %c0_5 = arith.constant 0 : index
    %c0_6 = arith.constant 0 : index
    %c0_7 = arith.constant 0 : index
    %6 = vector.load %arg6[%c0_5, %c0_6, %c0_7] : memref<2x4x128xf32, #tpu.memory_space<vmem>>, vector<2x4x128xf32>
    %7 = arith.addf %6, %5 : vector<2x4x128xf32>
    %c0_8 = arith.constant 0 : index
    %c0_9 = arith.constant 0 : index
    %c0_10 = arith.constant 0 : index
    %8 = vector.load %arg6[%c0_8, %c0_9, %c0_10] : memref<2x4x128xf32, #tpu.memory_space<vmem>>, vector<2x4x128xf32>
    tpu.vector_store %arg6[%c0_8, %c0_9, %c0_10], %7 {strides = array<i32>} : memref<2x4x128xf32, #tpu.memory_space<vmem>>, vector<2x4x128xf32>,
    %c0_i32_11 = arith.constant 0 : i32
    %9 = arith.cmpi eq, %arg1, %c0_i32_11 : i32
    %10 = arith.extui %9 : i1 to i32
    %c0_i32_12 = arith.constant 0 : i32
    %11 = arith.cmpi ne, %10, %c0_i32_12 : i32
    scf.if %11 {
      %c0_13 = arith.constant 0 : index
      %c0_14 = arith.constant 0 : index
      %c0_15 = arith.constant 0 : index
      %12 = vector.load %arg6[%c0_13, %c0_14, %c0_15] : memref<2x4x128xf32, #tpu.memory_space<vmem>>, vector<2x4x128xf32>
      %cst = arith.constant dense<0.000000e+00> : vector<2x4xf32>
      %13 = vector.multi_reduction <add>, %12, %cst [2] : vector<2x4x128xf32> to vector<2x4xf32>
      %cst_16 = arith.constant 3.906250e-03 : f32
      %14 = vector.broadcast %cst_16 : f32 to vector<2x4xf32>
      %15 = arith.mulf %13, %14 : vector<2x4xf32>
      %c0_17 = arith.constant 0 : index
      %c0_18 = arith.constant 0 : index
      %16 = vector.load %arg3[%c0_17, %c0_18] : memref<4x128xf32, #tpu.memory_space<vmem>>, vector<4x128xf32>
      %cst_19 = arith.constant dense<0.000000e+00> : vector<2x128xf32>
      %17 = tpu.matmul %15, %16, %cst_19 {dimension_numbers = #tpu.dot_dimension_numbers<[1], [0], [0], [1], [0, 0, 1, 1], [], []>} : vector<2x4xf32>, vector<4x128xf32>, vector<2x128xf32> -> vector<2x128xf32>
      %c0_20 = arith.constant 0 : index
      %c0_21 = arith.constant 0 : index
      %18 = vector.load %arg4[%c0_20, %c0_21] : memref<1x128xf32, #tpu.memory_space<vmem>>, vector<1x128xf32>
      %19 = vector.broadcast %18 : vector<1x128xf32> to vector<2x128xf32>
      %20 = arith.addf %17, %19 : vector<2x128xf32>
      %c0_22 = arith.constant 0 : index
      %c0_23 = arith.constant 0 : index
      %21 = vector.load %arg5[%c0_22, %c0_23] : memref<2x128xf32, #tpu.memory_space<vmem>>, vector<2x128xf32>
      tpu.vector_store %arg5[%c0_22, %c0_23], %20 {strides = array<i32>} : memref<2x128xf32, #tpu.memory_space<vmem>>, vector<2x128xf32>,
    } else {
    }
    return
  }
  func.func @transform_0(%arg0: i32, %arg1: i32) -> (i32, i32, i32) {
    %c0_i32 = arith.constant 0 : i32
    %c0_i32_0 = arith.constant 0 : i32
    return %arg0, %c0_i32, %arg1 : i32, i32, i32
  }
  func.func @transform_1(%arg0: i32, %arg1: i32) -> (i32, i32) {
    %c0_i32 = arith.constant 0 : i32
    %c0_i32_0 = arith.constant 0 : i32
    %c0_i32_1 = arith.constant 0 : i32
    return %c0_i32, %c0_i32_0 : i32, i32
  }
  func.func @transform_2(%arg0: i32, %arg1: i32) -> (i32, i32) {
    %c0_i32 = arith.constant 0 : i32
    %c0_i32_0 = arith.constant 0 : i32
    %c0_i32_1 = arith.constant 0 : i32
    return %c0_i32, %c0_i32_0 : i32, i32
  }
  func.func @transform_3(%arg0: i32, %arg1: i32) -> (i32, i32) {
    %c0_i32 = arith.constant 0 : i32
    %c0_i32_0 = arith.constant 0 : i32
    return %arg0, %c0_i32 : i32, i32
  }
}

</mosaic_0001>

<bundles_post_ra>
// kernel: tpu_custom_call.1
= control target key start
LH: loop header
LB: loop body
LE: loop exit
PB: predicated region body
PF: predicated region fallthrough
CT: control target
= control target key end

     0   :  { %8 = vsyncpa [#allocation4], 0  ;;  %s343_s0 = inlined_call_operand.hbm [shape: f32[2,4,256], index: 0, kind: input, shape index: {}]   ;;  %s344_s1 = inlined_call_operand.hbm [shape: f32[4,128], index: 1, kind: input, shape index: {}]   ;;  %s345_s2 = inlined_call_operand.vmem [shape: f32[1,128], index: 2, kind: input, shape index: {}]   ;;  %s346_s3 = inlined_call_operand.hbm [shape: f32[2,128], index: 3, kind: output, shape index: {}]  }
   0x1   :  { %9 = vsyncpa [#allocation7], 0 }
   0x2   :  { %10 = vsyncpa [#allocation5], 0  ;;  %s277_s12 = smov [#allocation3]   ;;  %s205_s16 = scalar_lea.hbm %s343_s0, 256 }
   0x3   :  { %s16_s13 = sshll.u32 %s277_s12, 4  ;;  %p206_p0 = scmp.ne.s32.totalorder %s343_s0, %s205_s16  ;;  %s17_s13 = int_to_ptr.vmem [resolvable:$true] %s16_s13 }
   0x4   :  { %p209_p1 = scmp.lt.u32.totalorder %s205_s16, %s343_s0 }
   0x6   :  { %p211_p2 = pnand %p209_p1, %p206_p0 }
   0x8   :  { %214 = shalt.err (!%p211_p2)
}
   0x9   :  { %s215_s21 = scalar_lea.vmem %s17_s13, 256  ;;  %p220_p4 = scmp.lt.s32.totalorder %s17_s13, %s17_s13 }
   0xa   :  { %p216_p3 = scmp.ne.s32.totalorder %s17_s13, %s215_s21  ;;  %p221_p5 = scmp.lt.s32.totalorder %s215_s21, %s215_s21 }
   0xc   :  { %p222_p6 = por %p221_p5, %p220_p4 }
   0xe   :  { %p223_p7 = pnand %p222_p6, %p216_p3 }
  0x10   :  { %226 = shalt.err (!%p223_p7)
}
  0x11   :  { %s278_s22 = smov 128   ;;  %s279_s23 = smov 8  }
  0x12   :  { %22 = dma.hbm_to_vmem [thread:$0]  %s343_s0, 256, %s17_s13, [#allocation4], %s278_s22, %s278_s22, %s279_s23  }
  0x13   :  { %s280_s26 = smov [#allocation6]   ;;  %s227_s30 = scalar_lea.hbm %s344_s1, 64 }
  0x14   :  { %s29_s27 = sshll.u32 %s280_s26, 4  ;;  %p228_p8 = scmp.ne.s32.totalorder %s344_s1, %s227_s30  ;;  %s30_s27 = int_to_ptr.vmem [resolvable:$true] %s29_s27 }
  0x15   :  { %p231_p9 = scmp.lt.u32.totalorder %s227_s30, %s344_s1 }
  0x17   :  { %p233_p10 = pnand %p231_p9, %p228_p8 }
  0x19   :  { %236 = shalt.err (!%p233_p10)
}
  0x1a   :  { %s237_s8 = scalar_lea.vmem %s30_s27, 64  ;;  %p242_p12 = scmp.lt.s32.totalorder %s30_s27, %s30_s27 }
  0x1b   :  { %p238_p11 = scmp.ne.s32.totalorder %s30_s27, %s237_s8  ;;  %p243_p13 = scmp.lt.s32.totalorder %s237_s8, %s237_s8 }
  0x1d   :  { %p244_p0 = por %p243_p13, %p242_p12 }
  0x1f   :  { %p245_p1 = pnand %p244_p0, %p238_p11 }
  0x21   :  { %248 = shalt.err (!%p245_p1)
}
  0x22   :  { %32 = dma.hbm_to_vmem [thread:$0]  %s344_s1, 64, %s30_s27, [#allocation7]  }
  0x23   :  { %271 = dma.done.wait [#allocation4], 256  }
  0x24   :  { %272 = vsyncadd [#allocation4], 4294967040 }
  0x25   :  { %273 = dma.done.wait [#allocation7], 64  }
  0x26   :  { %274 = vsyncadd [#allocation7], 4294967232  ;;  %v281_v0 = vmov 0.0   ;;  %v47_v1 = vld [vmem:[#allocation3] sm:$0xf]  ;;  %vm64_vm0 = vcmask 1043456   ;;  %v83_v16 = vlaneseq }
  0x27   :  { %45 = vst [vmem:[#allocation2] sm:$0xf] %v281_v0  ;;  %46 = vst [vmem:[#allocation2 + $0x4] sm:$0xf] %v281_v0  ;;  %193 = vmatprep.subr.mxu0 %v281_v0  ;;  %v49_v2 = vld [vmem:[#allocation3 + $0x4] sm:$0xf] }
  0x28   :  { %v48_v3 = vld [vmem:[#allocation3 + $0x8] sm:$0xf]  ;;  %v51_v4 = vadd.f32 %v49_v2, %v47_v1  ;;  %v50_v6 = vld [vmem:[#allocation3 + $0xc] sm:$0xf]  ;;  %v73_v15 = vld [vmem:[#allocation6] sm:$0xf] }
  0x29   :  { %v52_v8 = vadd.f32 %v50_v6, %v48_v3  ;;  %194 = vmatpush3.msk.msra.mxu0 %vm64_vm0, %v73_v15  ;;  %vm282_vm1 = vmmov 0   ;;  %v84_v17 = vand.u32 127, %v83_v16  ;;  %v86_v18 = vshrl.u32 %v83_v16, 7  ;;  %v188_v27 = vld [vmem:[%s345_s2] ss:$0 sm:$0xff]  ;;  %s283_s11 = smov [#allocation8]  }
  0x2a   :  { %195 = vmatprep.mubr.msk.f32.mxu0 %vm282_vm1, %v281_v0  ;;  %vm93_vm2 = vcmask 1041409   ;;  %vm95_vm3 = vcmask 31744   ;;  %s178_s12 = sshll.u32 %s283_s11, 4  ;;  %s179_s12 = int_to_ptr.vmem [resolvable:$true] %s178_s12 }
  0x2b   :  { %v87_v20 = vsub.s32 %v84_v17, %v86_v18  ;;  %s249_s13 = scalar_lea.vmem %s179_s12, 32  ;;  %p254_p3 = scmp.lt.s32.totalorder %s179_s12, %s179_s12 }
  0x2c   :  { %p250_p2 = scmp.ne.s32.totalorder %s179_s12, %s249_s13  ;;  %p255_p4 = scmp.lt.s32.totalorder %s249_s13, %s249_s13 }
  0x2e   :  { %v53_v5 = vld [vmem:[#allocation2] sm:$0xf]  ;;  %v54_v7 = vld [vmem:[#allocation2 + $0x4] sm:$0xf]  ;;  %p256_p5 = por %p255_p4, %p254_p3 }
  0x2f   :  { %v55_v9 = vadd.f32 %v53_v5, %v51_v4  ;;  %v56_v10 = vadd.f32 %v54_v7, %v52_v8 }
  0x30   :  { %p257_p6 = pnand %p256_p5, %p250_p2 }
  0x31   :  { %57 = vst [vmem:[#allocation2] sm:$0xf] %v55_v9  ;;  %58 = vst [vmem:[#allocation2 + $0x4] sm:$0xf] %v56_v10 }
  0x38   :  { %v62_v11 = vld [vmem:[#allocation2] sm:$0xf]  ;;  %v63_v13 = vld [vmem:[#allocation2 + $0x4] sm:$0xf] }
  0x39   :  { %v65_v12 = vsel %vm64_vm0, %v62_v11, 0.0  ;;  %v68_v14 = vsel %vm64_vm0, %v63_v13, 0.0 }
  0x3a   :  { %66 = vadd.xlane.f32.xlu0 %v65_v12 }
  0x3e   :  { %69 = vadd.xlane.f32.xlu0 %v68_v14 }
  0xc7   :  { %v67_v19 = vpop.xlane.xlu0 %66 }
  0xc8   :  { %v71_v21 = vmul.f32 0.00390625, %v67_v19 }
  0xca   :  { %v88_v24 = vrot.slane %v71_v21, %v87_v20 }
  0xcb   :  { %v70_v22 = vpop.xlane.xlu0 %69 }
  0xcc   :  { %v72_v23 = vmul.f32 0.00390625, %v70_v22 }
  0xce   :  { %v92_v25 = vrot.slane %v72_v23, %v87_v20 }
  0xd0   :  { %v94_v26 = vsel %vm93_vm2, %v92_v25, %v88_v24 }
  0xd1   :  { %196 = vmatmul.mubr.msk.f32.vlgmr.msra.gmra.mrb[0].mxu0 %vm95_vm3, %v94_v26 }
 0x1a4   :  { %v167_v28 = vpop.f32.mrb[0].mxu0 }
 0x1a5   :  { %v168_v29 = vadd.f32 %v188_v27, %v167_v28  ;;  %v197_v30 = vpop.f32.mrb[1].mxu0 }
 0x1a7   :  { %171 = vst [vmem:[#allocation8] sm:$0x3] %v168_v29 }
 0x1a8   :  { %260 = shalt.err (!%p257_p6)
}
 0x1a9   :  { %s261_s16 = scalar_lea.hbm %s346_s3, 32 }
 0x1aa   :  { %p262_p7 = scmp.ne.s32.totalorder %s346_s3, %s261_s16  ;;  %p265_p8 = scmp.lt.u32.totalorder %s261_s16, %s346_s3 }
 0x1ac   :  { %p267_p9 = pnand %p265_p8, %p262_p7 }
 0x1ae   :  { %270 = shalt.err (!%p267_p9)
}
 0x1af   :  { %181 = dma.vmem_to_hbm [thread:$0]  %s179_s12, 32, %s346_s3, [#allocation5]  }
 0x1b0   :  { %275 = dma.done.wait [#allocation5], 32  }
 0x1b1   :  { %276 = vsyncadd [#allocation5], 4294967264 }
 0x1b2   :  { %185 = vsyncpa [#allocation4], 1 }
 0x1b3   :  { %186 = vsyncpa [#allocation7], 1 }
 0x1b4   :  { %187 = vsyncpa [#allocation5], 1 }

</bundles_post_ra>
